<compile_context>
chip_gen: v7x
topology: tpu7x:2x2x1
jax: 0.10.0
libtpu: 0.0.40
codegen_flags: <defaults>
</compile_context>

<pallas_src>
import functools

import jax
import jax.numpy as jnp
from jax.experimental import pallas as pl
from jax.experimental.pallas import tpu as pltpu


# -----------------------------------------------------------------------------
# Path 1 (default): zero-copy flatten.  Output aliases the input HBM buffer;
# the bytes are already in place, so the body does nothing.
# -----------------------------------------------------------------------------
def _alias_flatten_kernel(x_hbm_ref, o_hbm_ref):
    # input_output_aliases={0: 0}: o_hbm_ref and x_hbm_ref are the same HBM
    # buffer.  Flatten of a contiguous array is a pure metadata change, so
    # there is no data movement and no compute.
    del x_hbm_ref, o_hbm_ref


# -----------------------------------------------------------------------------
# Path 2 (materialize=True): chunked HBM -> HBM DMA copy, no VMEM staging.
# -----------------------------------------------------------------------------
def _make_dma_flatten_kernel(rows, chunk_rows, n_chunks):
    def kernel(x_hbm_ref, o_hbm_ref, sems):
        # Issue all chunk DMAs back-to-back (<= 4 outstanding), then retire
        # them in order.  Chunks are contiguous row slabs of the (N, F) view,
        # so each DMA is one large contiguous HBM->HBM transfer; the DMA
        # engines do the work (no vld/vst, no TensorCore involvement).
        copies = []
        for c in range(n_chunks):          # static Python loop (n_chunks <= 4)
            start = c * chunk_rows
            size = min(chunk_rows, rows - start)
            cp = pltpu.make_async_copy(
                x_hbm_ref.at[pl.ds(start, size), :],
                o_hbm_ref.at[pl.ds(start, size), :],
                sems.at[c],
            )
            cp.start()
            copies.append(cp)
        for cp in copies:
            cp.wait()

    return kernel


def flatten_layer(x, *, materialize=False, max_outstanding_dmas=4):
    """PyTorch FlattenLayer.forward: x -> x.reshape(x.shape[0], -1)."""
    n = x.shape[0]
    feat = 1
    for d in x.shape[1:]:
        feat *= d

    # Free, contiguous reshape at the XLA level; the Pallas op below only
    # decides whether a distinct output buffer gets materialized.
    x2d = x.reshape(n, feat)
    out_shape = jax.ShapeDtypeStruct((n, feat), x.dtype)

    if not materialize:
        # Zero HBM traffic: the output buffer aliases the input buffer.
        return pl.pallas_call(
            _alias_flatten_kernel,
            out_shape=out_shape,
            in_specs=[pl.BlockSpec(memory_space=pl.ANY)],
            out_specs=pl.BlockSpec(memory_space=pl.ANY),
            input_output_aliases={0: 0},
        )(x2d)

    # Materialized copy: direct HBM->HBM DMAs.  No VMEM scratch is allocated,
    # so no vmem_limit_bytes tuning is needed on any generation (incl. v7x's
    # 64 MiB VMEM), and lane-density of the logical shape is irrelevant
    # (the DMA copies contiguous bytes, not vregs).
    n_chunks = max(1, min(max_outstanding_dmas, n))
    chunk_rows = pl.cdiv(n, n_chunks)
    n_chunks = pl.cdiv(n, chunk_rows)        # drop empty trailing chunks

    itemsize = jnp.dtype(x.dtype).itemsize
    return pl.pallas_call(
        _make_dma_flatten_kernel(n, chunk_rows, n_chunks),
        out_shape=out_shape,
        in_specs=[pl.BlockSpec(memory_space=pl.ANY)],
        out_specs=pl.BlockSpec(memory_space=pl.ANY),
        scratch_shapes=[pltpu.SemaphoreType.DMA((n_chunks,))],
        cost_estimate=pl.CostEstimate(
            flops=0,
            transcendentals=0,
            bytes_accessed=2 * n * feat * itemsize,
        ),
    )(x2d)


if __name__ == "__main__":
    key = jax.random.PRNGKey(0)
    x = jax.random.normal(key, (2, 4, 16, 16), dtype=jnp.float32)
    ref = x.reshape(x.shape[0], -1)

    # Default zero-copy (aliased) path.
    out = jax.jit(flatten_layer)(x)
    jax.block_until_ready(out)
    assert out.shape == (2, 4 * 16 * 16), out.shape
    assert jnp.array_equal(out, ref)

    # Materialized-copy path (chunked HBM->HBM DMA, no VMEM staging).
    out_copy = jax.jit(functools.partial(flatten_layer, materialize=True))(x)
    jax.block_until_ready(out_copy)
    assert out_copy.shape == (2, 4 * 16 * 16), out_copy.shape
    assert jnp.array_equal(out_copy, ref)

    print("KERNEL_OK")
</pallas_src>

<mosaic_0001>
module attributes {stable_mosaic.version = 11 : i64} {
  func.func @_alias_flatten_kernel(%arg0: memref<2x1024xf32, #tpu.memory_space<any>>, %arg1: memref<2x1024xf32, #tpu.memory_space<any>>) attributes {dimension_semantics = [], scalar_prefetch = 0 : i64, scratch_operands = 0 : i64, tpu.core_type = #tpu.core_type<tc>} {
    return
  }
}

</mosaic_0001>

<bundles_post_ra>
// kernel: flatten_layer.1
= control target key start
LH: loop header
LB: loop body
LE: loop exit
PB: predicated region body
PF: predicated region fallthrough
CT: control target
= control target key end

     0   :  { %s16_s0 = inlined_call_operand.hbm [shape: f32[2,1024], index: 0, kind: input, shape index: {}, may-alias: {0,1}]   ;;  %s17_s1 = inlined_call_operand.hbm [shape: f32[2,1024], index: 1, kind: output, shape index: {}, may-alias: {0,1}]  }

</bundles_post_ra>
